<compile_context>
chip_gen: v7x
topology: tpu7x:2x2x1
jax: 0.10.0
libtpu: 0.0.40
codegen_flags: <defaults>
</compile_context>

<pallas_src>
import jax
import jax.numpy as jnp
from jax.experimental import pallas as pl
from jax.experimental.pallas import tpu as pltpu

_LANE = 128
_SUBLANE = 8
_TWO_PI = 6.283185307179586


# --------------------------------------------------------------------------
# Kernel A (TPU backend): fused sample with in-kernel hardware PRNG.
#   out = mu + exp(log_sigma) * eps,  eps ~ N(0,1) via Box-Muller.
# --------------------------------------------------------------------------
def _rsample_prng_kernel(seed_ref, mu_ref, log_sigma_ref, out_ref):
    # Distinct PRNG stream per grid step -> independent eps per tile and a
    # result that is deterministic regardless of megacore step assignment.
    pltpu.prng_seed(seed_ref[0] + pl.program_id(0))
    rows, lanes = mu_ref.shape  # static block shape

    def _uniform01(shape):
        # Raw bits -> f32 in [0, 1) via the exponent trick (no int->float op).
        bits = pltpu.bitcast(pltpu.prng_random_bits(shape), jnp.uint32)
        fbits = (bits >> jnp.uint32(9)) | jnp.uint32(0x3F800000)  # [1, 2)
        return pltpu.bitcast(fbits, jnp.float32) - 1.0            # [0, 1)

    # Compute in f32 (v5e VPU/EUP have no bf16 path), cast at the store.
    mu = mu_ref[...].astype(jnp.float32)
    sigma = jnp.exp(log_sigma_ref[...].astype(jnp.float32))

    if rows % 16 == 0:
        # Use BOTH Box-Muller branches: cos for the top half of the tile, sin
        # for the bottom half -> half the PRNG draws and log/sqrt per element.
        half = rows // 2
        u1 = 1.0 - _uniform01((half, lanes))          # (0, 1] -> log() safe
        u2 = _uniform01((half, lanes))
        r = jnp.sqrt(-2.0 * jnp.log(u1))
        theta = _TWO_PI * u2
        out_ref[0:half, :] = (
            mu[0:half] + sigma[0:half] * (r * jnp.cos(theta))
        ).astype(out_ref.dtype)
        out_ref[half:rows, :] = (
            mu[half:rows] + sigma[half:rows] * (r * jnp.sin(theta))
        ).astype(out_ref.dtype)
    else:
        u1 = 1.0 - _uniform01((rows, lanes))
        u2 = _uniform01((rows, lanes))
        eps = jnp.sqrt(-2.0 * jnp.log(u1)) * jnp.cos(_TWO_PI * u2)
        out_ref[...] = (mu + sigma * eps).astype(out_ref.dtype)


# --------------------------------------------------------------------------
# Kernel B (portable fallback, CPU / interpret): eps supplied as an input.
# --------------------------------------------------------------------------
def _rsample_eps_kernel(mu_ref, log_sigma_ref, eps_ref, out_ref):
    mu = mu_ref[...].astype(jnp.float32)
    sigma = jnp.exp(log_sigma_ref[...].astype(jnp.float32))
    out_ref[...] = (mu + sigma * eps_ref[...].astype(jnp.float32)).astype(out_ref.dtype)


# --------------------------------------------------------------------------
# Wrapper: pad-free lane-dense view + roofline-sized tiles + tiny bypass.
# --------------------------------------------------------------------------
def variational_rsample(q_mu, q_log_sigma, seed, *,
                        target_tile_bytes=2 * 1024 * 1024,
                        min_kernel_elems=1024):
    """Reparameterized sample mu + exp(log_sigma) * eps via a Pallas kernel."""
    assert q_mu.shape == q_log_sigma.shape and q_mu.ndim == 2
    n, d = q_mu.shape
    total = n * d
    out_dtype = q_mu.dtype
    itemsize = jnp.dtype(out_dtype).itemsize

    # Tiny-input bypass: below one (8,128) tile the kernel is pure launch
    # overhead + masked stores; plain XLA is a strict win.
    if total < min_kernel_elems:
        eps = jax.random.normal(jax.random.PRNGKey(seed), (n, d), dtype=jnp.float32)
        x = q_mu.astype(jnp.float32) + jnp.exp(q_log_sigma.astype(jnp.float32)) * eps
        return x.astype(out_dtype)

    # Pad-free lane-dense view: widest W that divides n*d with >= 8 rows.
    # A contiguous reshape is free (no HBM pass), unlike the old pad/slice.
    W = None
    for w in (1024, 512, 256, 128):
        if total % w == 0 and (total // w) >= _SUBLANE:
            W = w
            break
    if W is not None:
        rows = total // W
        mu2 = q_mu.reshape(rows, W)
        ls2 = q_log_sigma.reshape(rows, W)
    else:
        # latent_dim not lane-friendly: tile (n, d) directly. A block whose
        # last dim equals the full array dim is always legal; stores are
        # lane-masked but we avoid any extra HBM traffic.
        rows, W = n, d
        mu2, ls2 = q_mu, q_log_sigma

    # Tile height: ~target_tile_bytes of f32 per tile (mem-bound roofline),
    # 8-aligned, but capped so the grid has >= 2 steps when possible so both
    # v7x TensorCores get work under dimension_semantics=("parallel",).
    br = max(_SUBLANE, (target_tile_bytes // (W * 4) // _SUBLANE) * _SUBLANE)
    cap = max(_SUBLANE, ((rows // 2) // _SUBLANE) * _SUBLANE)
    br = min(br, cap)
    grid = (pl.cdiv(rows, br),)   # ragged final block handled by Pallas

    tile_bytes = br * W * 4
    vmem_limit = min(64 * 1024 * 1024, max(32 * 1024 * 1024, 8 * tile_bytes))

    cparams = pltpu.CompilerParams(
        dimension_semantics=("parallel",),
        vmem_limit_bytes=vmem_limit,
    )

    use_hw_prng = jax.default_backend() == "tpu"

    if use_hw_prng:
        seed_arr = jnp.asarray([seed], dtype=jnp.int32)
        out = pl.pallas_call(
            _rsample_prng_kernel,
            out_shape=jax.ShapeDtypeStruct((rows, W), out_dtype),
            grid_spec=pltpu.PrefetchScalarGridSpec(
                num_scalar_prefetch=1,                 # seed lives in SMEM
                grid=grid,
                in_specs=[
                    pl.BlockSpec((br, W), lambda i, seed_ref: (i, 0)),
                    pl.BlockSpec((br, W), lambda i, seed_ref: (i, 0)),
                ],
                out_specs=pl.BlockSpec((br, W), lambda i, seed_ref: (i, 0)),
            ),
            compiler_params=cparams,
            cost_estimate=pl.CostEstimate(
                flops=10 * total,
                transcendentals=4 * total,
                bytes_accessed=3 * total * itemsize,
            ),
        )(seed_arr, mu2, ls2)
    else:
        # Portable path: pltpu.prng_* has no CPU/interpret lowering, so eps is
        # drawn with the JAX PRNG and streamed through the same fused kernel.
        eps = jax.random.normal(jax.random.PRNGKey(seed), (rows, W), dtype=jnp.float32)
        out = pl.pallas_call(
            _rsample_eps_kernel,
            out_shape=jax.ShapeDtypeStruct((rows, W), out_dtype),
            grid_spec=pltpu.PrefetchScalarGridSpec(
                num_scalar_prefetch=0,
                grid=grid,
                in_specs=[
                    pl.BlockSpec((br, W), lambda i: (i, 0)),
                    pl.BlockSpec((br, W), lambda i: (i, 0)),
                    pl.BlockSpec((br, W), lambda i: (i, 0)),
                ],
                out_specs=pl.BlockSpec((br, W), lambda i: (i, 0)),
            ),
            compiler_params=cparams,
            cost_estimate=pl.CostEstimate(
                flops=3 * total,
                transcendentals=total,
                bytes_accessed=4 * total * itemsize,
            ),
        )(mu2, ls2, eps)

    return out.reshape(n, d)   # contiguous reshape, free


# --------------------------------------------------------------------------
# Loss-term / prior plumbing (pure jnp — belongs to the loss, not forward())
# --------------------------------------------------------------------------
class NormalPrior:
    """Minimal stand-in for gpytorch's NormalPrior: exposes .loc / .variance."""

    def __init__(self, loc, scale):
        self.loc = loc
        self.scale = scale

    @property
    def variance(self):
        return self.scale ** 2


class kl_gaussian_loss_term:
    """KL(q || p) summed over points, / n / data_dim.

    Matches the torch code, including its quirk of using the prior *variance*
    as the Normal scale.  sigma = exp(q_log_sigma) is computed lazily here so
    forward() never materializes it.
    """

    def __init__(self, q_mu, q_log_sigma, p_mu, p_scale, n, data_dim):
        self.q_mu, self.q_log_sigma = q_mu, q_log_sigma
        self.p_mu, self.p_scale = p_mu, p_scale
        self.n, self.data_dim = n, data_dim

    def loss(self):
        # TODO(synk): fuse these per-tile partial sums into the rsample kernel
        # (mu / log_sigma are already resident in VMEM) if KL becomes hot.
        q_sigma = jnp.exp(self.q_log_sigma)
        var_ratio = (q_sigma / self.p_scale) ** 2
        t1 = ((self.q_mu - self.p_mu) / self.p_scale) ** 2
        kl = 0.5 * (var_ratio + t1 - 1.0 - jnp.log(var_ratio))
        kl_per_latent_dim = kl.sum(axis=0)
        kl_per_point = kl_per_latent_dim.sum() / self.n
        return kl_per_point / self.data_dim


class VariationalLatentVariable:
    """JAX/Pallas port of the PyTorch VariationalLatentVariable."""

    def __init__(self, n, data_dim, latent_dim, X_init, prior_x, *, q_log_sigma=None):
        assert X_init.shape == (n, latent_dim)
        self.n = n
        self.data_dim = data_dim
        self.latent_dim = latent_dim
        self.prior_x = prior_x
        self.q_mu = X_init
        if q_log_sigma is None:
            q_log_sigma = jax.random.normal(jax.random.PRNGKey(1), (n, latent_dim),
                                            dtype=X_init.dtype)
        self.q_log_sigma = q_log_sigma
        self._added_loss_terms = {"x_kl": None}

    def added_loss_terms(self):
        return self._added_loss_terms

    def forward(self, batch_idx=None, seed=0):
        if batch_idx is None:
            q_mu_b, q_ls_b = self.q_mu, self.q_log_sigma
            p_mu_b, p_var_b = self.prior_x.loc, self.prior_x.variance
            m = self.n
        else:
            batch_idx = jnp.asarray(batch_idx)
            q_mu_b = jnp.take(self.q_mu, batch_idx, axis=0)
            q_ls_b = jnp.take(self.q_log_sigma, batch_idx, axis=0)
            p_mu_b = jnp.take(self.prior_x.loc, batch_idx, axis=0)
            p_var_b = jnp.take(self.prior_x.variance, batch_idx, axis=0)
            m = batch_idx.shape[0]

        # KL added-loss term (lazy; consumed by the training loss, not here).
        self._added_loss_terms["x_kl"] = kl_gaussian_loss_term(
            q_mu_b, q_ls_b, p_mu_b, p_var_b, m, self.data_dim)

        # Hot path: fused reparameterized sample.
        return variational_rsample(q_mu_b, q_ls_b, seed)


# --------------------------------------------------------------------------
# Demo / self-check
# --------------------------------------------------------------------------
if __name__ == "__main__":
    key = jax.random.PRNGKey(0)
    n, data_dim, latent_dim = 64, 16, 32   # 64*32 = 2048 elems -> (8, 256) view
    k1, k2 = jax.random.split(key)
    X_init = jax.random.normal(k1, (n, latent_dim), dtype=jnp.float32)
    q_log_sigma_init = 0.1 * jax.random.normal(k2, (n, latent_dim), dtype=jnp.float32)

    prior = NormalPrior(loc=jnp.zeros((n, latent_dim), jnp.float32),
                        scale=jnp.ones((n, latent_dim), jnp.float32))

    lv = VariationalLatentVariable(n, data_dim, latent_dim, X_init, prior,
                                   q_log_sigma=q_log_sigma_init)

    out = jax.block_until_ready(lv.forward(seed=0))
    out_again = jax.block_until_ready(lv.forward(seed=0))

    # Shape / dtype / finiteness.
    assert out.shape == (n, latent_dim)
    assert out.dtype == jnp.float32
    assert bool(jnp.all(jnp.isfinite(out)))

    # Same seed -> identical sample (deterministic seeding on both paths).
    assert bool(jnp.allclose(out, out_again))

    # The sample must be mu + sigma * eps with eps ~ N(0,1): check the implied
    # eps is bounded with sane first/second moments (loose tolerances).
    sigma = jnp.exp(q_log_sigma_init)
    z = (out - X_init) / sigma
    assert bool(jnp.all(jnp.abs(z) < 10.0))
    assert abs(float(z.mean())) < 0.25
    assert abs(float(z.std()) - 1.0) < 0.25

    # KL added-loss term (pure jnp, loss path) is finite.
    kl_val = lv.added_loss_terms()["x_kl"].loss()
    assert bool(jnp.isfinite(kl_val))

    print("KERNEL_OK")
</pallas_src>

<mosaic_0001>
module attributes {stable_mosaic.version = 11 : i64} {
  func.func @_rsample_eps_kernel(%arg0: i32, %arg1: memref<8x256xf32, #tpu.memory_space<vmem>>, %arg2: memref<8x256xf32, #tpu.memory_space<vmem>>, %arg3: memref<8x256xf32, #tpu.memory_space<vmem>>, %arg4: memref<8x256xf32, #tpu.memory_space<vmem>>) attributes {dimension_semantics = [#tpu.dimension_semantics<parallel>], iteration_bounds = array<i64: 1>, scalar_prefetch = 0 : i64, scratch_operands = 0 : i64, tpu.core_type = #tpu.core_type<tc>, window_params = [{transform_indices = @transform_0, window_bounds = array<i64: 8, 256>}, {transform_indices = @transform_1, window_bounds = array<i64: 8, 256>}, {transform_indices = @transform_2, window_bounds = array<i64: 8, 256>}, {transform_indices = @transform_3, window_bounds = array<i64: 8, 256>}]} {
    %c0 = arith.constant 0 : index
    %c0_0 = arith.constant 0 : index
    %0 = vector.load %arg1[%c0, %c0_0] : memref<8x256xf32, #tpu.memory_space<vmem>>, vector<8x256xf32>
    %c0_1 = arith.constant 0 : index
    %c0_2 = arith.constant 0 : index
    %1 = vector.load %arg2[%c0_1, %c0_2] : memref<8x256xf32, #tpu.memory_space<vmem>>, vector<8x256xf32>
    %2 = math.exp %1 : vector<8x256xf32>
    %c0_3 = arith.constant 0 : index
    %c0_4 = arith.constant 0 : index
    %3 = vector.load %arg3[%c0_3, %c0_4] : memref<8x256xf32, #tpu.memory_space<vmem>>, vector<8x256xf32>
    %4 = arith.mulf %2, %3 : vector<8x256xf32>
    %5 = arith.addf %0, %4 : vector<8x256xf32>
    %c0_5 = arith.constant 0 : index
    %c0_6 = arith.constant 0 : index
    %6 = vector.load %arg4[%c0_5, %c0_6] : memref<8x256xf32, #tpu.memory_space<vmem>>, vector<8x256xf32>
    tpu.vector_store %arg4[%c0_5, %c0_6], %5 {strides = array<i32>} : memref<8x256xf32, #tpu.memory_space<vmem>>, vector<8x256xf32>,
    return
  }
  func.func @transform_0(%arg0: i32) -> (i32, i32) {
    %c0_i32 = arith.constant 0 : i32
    %c0_i32_0 = arith.constant 0 : i32
    return %arg0, %c0_i32 : i32, i32
  }
  func.func @transform_1(%arg0: i32) -> (i32, i32) {
    %c0_i32 = arith.constant 0 : i32
    %c0_i32_0 = arith.constant 0 : i32
    return %arg0, %c0_i32 : i32, i32
  }
  func.func @transform_2(%arg0: i32) -> (i32, i32) {
    %c0_i32 = arith.constant 0 : i32
    %c0_i32_0 = arith.constant 0 : i32
    return %arg0, %c0_i32 : i32, i32
  }
  func.func @transform_3(%arg0: i32) -> (i32, i32) {
    %c0_i32 = arith.constant 0 : i32
    %c0_i32_0 = arith.constant 0 : i32
    return %arg0, %c0_i32 : i32, i32
  }
}

</mosaic_0001>

<bundles_post_ra>
// kernel: tpu_custom_call.1
= control target key start
LH: loop header
LB: loop body
LE: loop exit
PB: predicated region body
PF: predicated region fallthrough
CT: control target
= control target key end

     0   :  { %8 = vsyncpa [#allocation3], 0  ;;  %s256_s0 = inlined_call_operand.hbm [shape: f32[8,256], index: 0, kind: input, shape index: {}]   ;;  %s257_s1 = inlined_call_operand.hbm [shape: f32[8,256], index: 1, kind: input, shape index: {}]   ;;  %s258_s2 = inlined_call_operand.hbm [shape: f32[8,256], index: 2, kind: input, shape index: {}]   ;;  %s259_s3 = inlined_call_operand.hbm [shape: f32[8,256], index: 3, kind: output, shape index: {}]  }
   0x1   :  { %9 = vsyncpa [#allocation6], 0 }
   0x2   :  { %10 = vsyncpa [#allocation4], 0  ;;  %s184_s12 = smov [#allocation5]   ;;  %s185_s14 = smov [#allocation2]  }
   0x3   :  { %s27_s13 = sshll.u32 %s184_s12, 4  ;;  %s17_s15 = sshll.u32 %s185_s14, 4  ;;  %s28_s13 = int_to_ptr.vmem [resolvable:$true] %s27_s13  ;;  %s18_s15 = int_to_ptr.vmem [resolvable:$true] %s17_s15 }
   0x4   :  { %s90_s18 = scalar_lea.hbm %s257_s1, 256 }
   0x5   :  { %p91_p0 = scmp.ne.s32.totalorder %s257_s1, %s90_s18  ;;  %p94_p1 = scmp.lt.u32.totalorder %s90_s18, %s257_s1 }
   0x7   :  { %p96_p2 = pnand %p94_p1, %p91_p0 }
   0x9   :  { %99 = shalt.err (!%p96_p2)
}
   0xa   :  { %s100_s23 = scalar_lea.vmem %s28_s13, 256  ;;  %p105_p4 = scmp.lt.s32.totalorder %s28_s13, %s28_s13 }
   0xb   :  { %p101_p3 = scmp.ne.s32.totalorder %s28_s13, %s100_s23  ;;  %p106_p5 = scmp.lt.s32.totalorder %s100_s23, %s100_s23 }
   0xd   :  { %p107_p6 = por %p106_p5, %p105_p4 }
   0xf   :  { %p108_p7 = pnand %p107_p6, %p101_p3 }
  0x11   :  { %111 = shalt.err (!%p108_p7)
}
  0x12   :  { %30 = dma.hbm_to_vmem [thread:$0]  %s257_s1, 256, %s28_s13, [#allocation6]  }
  0x13   :  { %s112_s28 = scalar_lea.hbm %s256_s0, 256 }
  0x14   :  { %p113_p8 = scmp.ne.s32.totalorder %s256_s0, %s112_s28  ;;  %p116_p9 = scmp.lt.u32.totalorder %s112_s28, %s256_s0 }
  0x16   :  { %p118_p10 = pnand %p116_p9, %p113_p8 }
  0x18   :  { %121 = shalt.err (!%p118_p10)
}
  0x19   :  { %s122_s6 = scalar_lea.vmem %s18_s15, 256  ;;  %p127_p12 = scmp.lt.s32.totalorder %s18_s15, %s18_s15 }
  0x1a   :  { %p123_p11 = scmp.ne.s32.totalorder %s18_s15, %s122_s6  ;;  %p128_p13 = scmp.lt.s32.totalorder %s122_s6, %s122_s6 }
  0x1c   :  { %p129_p0 = por %p128_p13, %p127_p12 }
  0x1e   :  { %p130_p1 = pnand %p129_p0, %p123_p11 }
  0x20   :  { %133 = shalt.err (!%p130_p1)
}
  0x21   :  { %20 = dma.hbm_to_vmem [thread:$0]  %s256_s0, 256, %s18_s15, [#allocation3]  }
  0x22   :  { %s186_s8 = smov [#allocation7]   ;;  %s134_s12 = scalar_lea.hbm %s258_s2, 256 }
  0x23   :  { %s37_s9 = sshll.u32 %s186_s8, 4  ;;  %p135_p2 = scmp.ne.s32.totalorder %s258_s2, %s134_s12  ;;  %s38_s9 = int_to_ptr.vmem [resolvable:$true] %s37_s9 }
  0x24   :  { %p138_p3 = scmp.lt.u32.totalorder %s134_s12, %s258_s2 }
  0x26   :  { %p140_p4 = pnand %p138_p3, %p135_p2 }
  0x28   :  { %143 = shalt.err (!%p140_p4)
}
  0x29   :  { %s144_s18 = scalar_lea.vmem %s38_s9, 256  ;;  %p149_p6 = scmp.lt.s32.totalorder %s38_s9, %s38_s9 }
  0x2a   :  { %p145_p5 = scmp.ne.s32.totalorder %s38_s9, %s144_s18  ;;  %p150_p7 = scmp.lt.s32.totalorder %s144_s18, %s144_s18 }
  0x2c   :  { %p151_p8 = por %p150_p7, %p149_p6 }
  0x2e   :  { %p152_p9 = pnand %p151_p8, %p145_p5 }
  0x30   :  { %155 = shalt.err (!%p152_p9)
}
  0x31   :  { %40 = dma.hbm_to_vmem [thread:$0]  %s258_s2, 256, %s38_s9, [#allocation6]  }
  0x32   :  { %178 = dma.done.wait [#allocation3], 256  }
  0x33   :  { %179 = vsyncadd [#allocation3], 4294967040 }
  0x34   :  { %180 = dma.done.wait [#allocation6], 512  }
  0x35   :  { %181 = vsyncadd [#allocation6], 4294966784  ;;  %v52_v0 = vld [vmem:[#allocation5] sm:$0xff]  ;;  %v53_v2 = vld [vmem:[#allocation5 + $0x8] sm:$0xff]  ;;  %s187_s19 = smov [#allocation8]  }
  0x36   :  { %v54_v1 = vmul.f32 1.442695, %v52_v0  ;;  %v56_v3 = vmul.f32 1.442695, %v53_v2  ;;  %v58_v4 = vld [vmem:[#allocation7] sm:$0xff]  ;;  %v59_v5 = vld [vmem:[#allocation7 + $0x8] sm:$0xff] }
  0x37   :  { %v50_v7 = vld [vmem:[#allocation2] sm:$0xff]  ;;  %v51_v10 = vld [vmem:[#allocation2 + $0x8] sm:$0xff]  ;;  %s72_s20 = sshll.u32 %s187_s19, 4  ;;  %s73_s20 = int_to_ptr.vmem [resolvable:$true] %s72_s20 }
  0x38   :  { %86 = vpow2.f32 %v54_v1  ;;  %s156_s2 = scalar_lea.vmem %s73_s20, 256  ;;  %p161_p11 = scmp.lt.s32.totalorder %s73_s20, %s73_s20 }
  0x39   :  { %88 = vpow2.f32 %v56_v3  ;;  %p157_p10 = scmp.ne.s32.totalorder %s73_s20, %s156_s2  ;;  %p162_p12 = scmp.lt.s32.totalorder %s156_s2, %s156_s2 }
  0x3b   :  { %p163_p13 = por %p162_p12, %p161_p11 }
  0x3d   :  { %p164_p0 = pnand %p163_p13, %p157_p10 }
  0x42   :  { %v87_v6 = vpop.eup %86 }
  0x43   :  { %v89_v8 = vpop.eup %88  ;;  %v60_v9 = vmul.f32 %v87_v6, %v58_v4 }
  0x44   :  { %v61_v11 = vmul.f32 %v89_v8, %v59_v5 }
  0x45   :  { %v62_v12 = vadd.f32 %v60_v9, %v50_v7 }
  0x46   :  { %v63_v13 = vadd.f32 %v61_v11, %v51_v10 }
  0x47   :  { %64 = vst [vmem:[#allocation8] sm:$0xff] %v62_v12 }
  0x48   :  { %65 = vst [vmem:[#allocation8 + $0x8] sm:$0xff] %v63_v13 }
  0x49   :  { %167 = shalt.err (!%p164_p0)
}
  0x4a   :  { %s168_s23 = scalar_lea.hbm %s259_s3, 256 }
  0x4b   :  { %p169_p1 = scmp.ne.s32.totalorder %s259_s3, %s168_s23  ;;  %p172_p2 = scmp.lt.u32.totalorder %s168_s23, %s259_s3 }
  0x4d   :  { %p174_p3 = pnand %p172_p2, %p169_p1 }
  0x4f   :  { %177 = shalt.err (!%p174_p3)
}
  0x50   :  { %75 = dma.vmem_to_hbm [thread:$0]  %s73_s20, 256, %s259_s3, [#allocation4]  }
  0x51   :  { %182 = dma.done.wait [#allocation4], 256  }
  0x52   :  { %183 = vsyncadd [#allocation4], 4294967040 }
  0x53   :  { %79 = vsyncpa [#allocation3], 1 }
  0x54   :  { %80 = vsyncpa [#allocation6], 1 }
  0x55   :  { %81 = vsyncpa [#allocation4], 1 }

</bundles_post_ra>
